<compile_context>
chip_gen: v7x
topology: tpu7x:2x2x1
jax: 0.10.0
libtpu: 0.0.40
codegen_flags: <defaults>
</compile_context>

<pallas_src>
import functools

import jax
import jax.numpy as jnp
from jax import lax
from jax.experimental import pallas as pl
from jax.experimental.pallas import tpu as pltpu


def _round_up(n, m):
    return ((n + m - 1) // m) * m


def _pick_tile(n, align, max_tile):
    """Pick a block size for a dimension of size n.

    Preference order:
      1. n <= max_tile               -> single full-extent block (always legal, no pad)
      2. divisor of align-rounded n  -> tiled with (almost) no padding and therefore no
                                        O(N^2) slice-copy of the score matrix afterwards
      3. fallback                    -> pad to a multiple of max_tile (final slice needed)
    Returns (tile, padded_n).
    """
    if n <= max_tile:
        return n, n
    t_max = max(align, (max_tile // align) * align)
    n_aligned = _round_up(n, align)
    t = t_max
    while n_aligned % t != 0:
        t -= align
    if t * 8 >= t_max:               # reject tiny divisors (per-grid-step overhead)
        return t, n_aligned
    return t_max, _round_up(n, t_max)


# ----------------------------------------------------------------------------
# Shared MLP math (f32 activations, compute-dtype MXU operands, f32 accumulation)
# ----------------------------------------------------------------------------
def _mlp_body(x, wb_refs, activation):
    n_layers = len(wb_refs) // 2
    h = x.astype(jnp.float32)
    for i in range(n_layers):
        w = wb_refs[2 * i][...]                         # pre-cast to compute_dtype
        b = wb_refs[2 * i + 1][...].astype(jnp.float32)
        h = jnp.dot(h.astype(w.dtype), w, preferred_element_type=jnp.float32) + b
        if i < n_layers - 1:
            h = jnp.maximum(h, 0.0) if activation == "relu" else jnp.tanh(h)
    return h


# ----------------------------------------------------------------------------
# Phase 1: MLP tower kernel (tiled over batch rows; weights resident in VMEM)
# ----------------------------------------------------------------------------
def _tower_kernel(n_layers, activation, transpose_out, x_ref, *refs):
    out_ref = refs[-1]
    h = _mlp_body(x_ref[...], refs[:2 * n_layers], activation)
    if transpose_out:
        h = h.T                       # (tile, E) -> (E, tile): lane-dense output store
    out_ref[...] = h.astype(out_ref.dtype)


def _mlp_embed(x, params, activation, compute_dtype, tile_rows, transpose_out):
    """MLP embeddings, tiled over batch rows.

    transpose_out=True  -> returns (E, n_pad) (lane-dense store, natural [K,N] RHS).
    transpose_out=False -> returns (n_pad, E).
    """
    n, d = x.shape
    e = params[-1][0].shape[1]
    n_layers = len(params)
    c_bytes = jnp.dtype(compute_dtype).itemsize

    # Transposed output: the row tile is the lane dim of the output block -> align 128.
    # Plain output: row tile is the sublane dim -> align 8 (16 for 16-bit dtypes).
    align = 128 if transpose_out else (16 if c_bytes == 2 else 8)
    tile, n_pad = _pick_tile(n, align, tile_rows)
    if n_pad != n:
        x = jnp.pad(x, ((0, n_pad - n), (0, 0)))

    flat = []
    in_specs = [pl.BlockSpec((tile, d), lambda i: (i, 0))]
    for w, b in params:
        flat += [w.astype(compute_dtype), b.astype(jnp.float32)]
        # Whole-array blocks + constant index_map -> weights stay resident in VMEM.
        in_specs.append(pl.BlockSpec(w.shape, lambda i: (0, 0)))
        in_specs.append(pl.BlockSpec(b.shape, lambda i: (0, 0)))

    if transpose_out:
        out_shape = jax.ShapeDtypeStruct((e, n_pad), compute_dtype)
        out_spec = pl.BlockSpec((e, tile), lambda i: (0, i))
    else:
        out_shape = jax.ShapeDtypeStruct((n_pad, e), compute_dtype)
        out_spec = pl.BlockSpec((tile, e), lambda i: (i, 0))

    layer_dims = [d] + [w.shape[1] for w, _ in params]
    flops = 2 * n_pad * sum(layer_dims[i] * layer_dims[i + 1] for i in range(n_layers))
    transcendentals = n_pad * sum(layer_dims[1:-1]) if activation == "tanh" else 0
    param_bytes = sum(w.size * c_bytes + b.size * 4 for w, b in params)
    bytes_accessed = x.size * x.dtype.itemsize + param_bytes + n_pad * e * c_bytes

    kernel = functools.partial(_tower_kernel, n_layers, activation, transpose_out)
    return pl.pallas_call(
        kernel,
        out_shape=out_shape,
        grid=(n_pad // tile,),
        in_specs=in_specs,
        out_specs=out_spec,
        compiler_params=pltpu.CompilerParams(dimension_semantics=("parallel",)),
        cost_estimate=pl.CostEstimate(flops=flops, transcendentals=transcendentals,
                                      bytes_accessed=bytes_accessed),
    )(x, *flat)


# ----------------------------------------------------------------------------
# Phase 2: tiled score matmul  scores = hy @ gxt   (hy: (Ny,E), gxt: (E,Nx))
# ----------------------------------------------------------------------------
def _score_kernel(hy_ref, gxt_ref, out_ref):
    out_ref[...] = jnp.dot(hy_ref[...], gxt_ref[...],
                           preferred_element_type=jnp.float32).astype(out_ref.dtype)


def _score_matmul(hy, gxt, score_dtype, tile_y, tile_x):
    ny_p, e = hy.shape
    _, nx_p = gxt.shape
    out_bytes = jnp.dtype(score_dtype).itemsize

    ty_align = 16 if (out_bytes == 2 or hy.dtype.itemsize == 2) else 8
    ty, ny_pp = _pick_tile(ny_p, ty_align, tile_y)
    tx, nx_pp = _pick_tile(nx_p, 128, tile_x)

    # Keep double-buffered tiles under the smallest scoped-VMEM default (v5e 16 MiB,
    # v7x has only 64 MiB physical): budget ~12 MiB for 2x(out + hy + gxt) blocks.
    def _buf_bytes(ty_, tx_):
        return 2 * (ty_ * tx_ * out_bytes + ty_ * e * hy.dtype.itemsize
                    + e * tx_ * gxt.dtype.itemsize)
    budget = 12 * 1024 * 1024
    while _buf_bytes(ty, tx) > budget and tx > 128 and tx % 256 == 0:
        tx //= 2
    while _buf_bytes(ty, tx) > budget and ty > ty_align and ty % (2 * ty_align) == 0:
        ty //= 2

    # v7x has 2 TensorCores sharded over "parallel" axes: avoid a degenerate (1,1) grid.
    if ny_pp // ty == 1 and nx_pp // tx == 1 and nx_pp >= 256 and nx_pp % 256 == 0:
        tx = nx_pp // 2

    if ny_pp != ny_p:
        hy = jnp.pad(hy, ((0, ny_pp - ny_p), (0, 0)))
    if nx_pp != nx_p:
        gxt = jnp.pad(gxt, ((0, 0), (0, nx_pp - nx_p)))

    n_row_tiles = ny_pp // ty
    flops = 2 * ny_pp * nx_pp * e
    # hy read once (block index constant over the j sweep), gxt re-read per row tile.
    bytes_accessed = (hy.size * hy.dtype.itemsize
                      + gxt.size * gxt.dtype.itemsize * n_row_tiles
                      + ny_pp * nx_pp * out_bytes)

    return pl.pallas_call(
        _score_kernel,
        out_shape=jax.ShapeDtypeStruct((ny_pp, nx_pp), score_dtype),
        grid=(ny_pp // ty, nx_pp // tx),
        in_specs=[
            pl.BlockSpec((ty, e), lambda i, j: (i, 0)),
            pl.BlockSpec((e, tx), lambda i, j: (0, j)),
        ],
        out_specs=pl.BlockSpec((ty, tx), lambda i, j: (i, j)),
        compiler_params=pltpu.CompilerParams(
            dimension_semantics=("parallel", "parallel")),
        cost_estimate=pl.CostEstimate(flops=flops, transcendentals=0,
                                      bytes_accessed=bytes_accessed),
    )(hy, gxt)


# ----------------------------------------------------------------------------
# Fused path (small/medium N): towers + score matmul in ONE pallas_call.
# Removes two kernel launches and the HBM roundtrip of the embeddings.
# ----------------------------------------------------------------------------
def _fused_kernel(n_g, n_h, activation, x_ref, y_ref, *refs):
    out_ref = refs[-1]
    g_refs = refs[:2 * n_g]
    h_refs = refs[2 * n_g:2 * (n_g + n_h)]
    gx = _mlp_body(x_ref[...], g_refs, activation)        # (nx, E) f32
    hy = _mlp_body(y_ref[...], h_refs, activation)        # (ny, E) f32
    out_ref[...] = lax.dot_general(
        hy, gx, dimension_numbers=(((1,), (1,)), ((), ())),
        preferred_element_type=jnp.float32).astype(out_ref.dtype)


def _fused_forward(x, y, g_params, h_params, activation, compute_dtype, score_dtype):
    nx, ny = x.shape[0], y.shape[0]
    flat = []
    for w, b in list(g_params) + list(h_params):
        flat += [w.astype(compute_dtype), b.astype(jnp.float32)]
    kernel = functools.partial(_fused_kernel, len(g_params), len(h_params), activation)
    return pl.pallas_call(
        kernel,
        out_shape=jax.ShapeDtypeStruct((ny, nx), score_dtype),
    )(x, y, *flat)


def _fused_vmem_bytes(x, y, g_params, h_params, compute_dtype, score_dtype):
    c_bytes = jnp.dtype(compute_dtype).itemsize

    def tower(n, d, params):
        widest = max([d] + [w.shape[1] for w, _ in params])
        act = 2 * n * widest * 4                           # a couple of live f32 acts
        p = sum(w.size * c_bytes + 4 * b.size for w, b in params)
        return act + p

    nx, ny = x.shape[0], y.shape[0]
    return (x.size * 4 + y.size * 4
            + ny * nx * jnp.dtype(score_dtype).itemsize
            + tower(nx, x.shape[1], g_params) + tower(ny, y.shape[1], h_params))


# ----------------------------------------------------------------------------
# Public forward: scores[i, j] = <h(y_i), g(x_j)>  (== SeparableCritic.forward)
# ----------------------------------------------------------------------------
def separable_critic_forward(x, y, g_params, h_params, activation="relu",
                             compute_dtype=jnp.bfloat16, score_dtype=jnp.float32,
                             tower_tile_rows=2048, tile_y=512, tile_x=2048,
                             fuse_max=1024):
    """SeparableCritic.forward(x, y).

    compute_dtype: dtype of MXU operands / stored embeddings.  bf16 (default) is
      MXU-native on v5e/v6e/v7x and halves phase-1 writeback + phase-2 operand DMA;
      pass jnp.float32 if downstream needs bit-tight scores.  Accumulation is f32.
    score_dtype: dtype of the returned score matrix.  bf16 halves the dominant HBM
      writeback of the memory-bound score matmul (accuracy/speed knob).
    """
    assert activation in ("relu", "tanh")
    nx, ny = x.shape[0], y.shape[0]

    # Small/medium batches: one fused kernel, exact output shape, no padding.
    if (nx <= fuse_max and ny <= fuse_max and
            _fused_vmem_bytes(x, y, g_params, h_params, compute_dtype,
                              score_dtype) <= 10 * 1024 * 1024):
        return _fused_forward(x, y, g_params, h_params, activation,
                              compute_dtype, score_dtype)

    # TODO(synk): on v7x, run the g and h towers concurrently on the two TensorCores
    # (fused pallas_call with a leading size-2 "parallel" axis); they run serially here.
    gxt = _mlp_embed(x, g_params, activation, compute_dtype, tower_tile_rows,
                     transpose_out=True)       # (E, nx_p) lane-dense store
    hy = _mlp_embed(y, h_params, activation, compute_dtype, tower_tile_rows,
                    transpose_out=False)       # (ny_p, E)
    scores = _score_matmul(hy, gxt, score_dtype, tile_y, tile_x)
    if scores.shape != (ny, nx):
        # Only taken for batch sizes with no exact tiling (junk padded rows/cols from
        # the nonzero embeddings of zero-padded inputs are discarded here).
        scores = scores[:ny, :nx]
    return scores


# ----------------------------------------------------------------------------
# Param init + plain-JAX reference
# ----------------------------------------------------------------------------
def init_mlp_params(key, dim, hidden_dim, output_dim, layers):
    """Linear(dim,h)+act, layers x [Linear(h,h)+act], Linear(h,out) -> layers+2 linears."""
    dims = [dim] + [hidden_dim] * (layers + 1) + [output_dim]
    params = []
    for i in range(len(dims) - 1):
        key, kw, kb = jax.random.split(key, 3)
        w = jax.random.normal(kw, (dims[i], dims[i + 1]), jnp.float32) * (
            1.0 / jnp.sqrt(dims[i]))
        b = jax.random.normal(kb, (1, dims[i + 1]), jnp.float32) * 0.01
        params.append((w, b))
    return params


def _ref_mlp(x, params, activation="relu"):
    h = x
    for i, (w, b) in enumerate(params):
        h = jnp.dot(h, w, precision=lax.Precision.HIGHEST) + b
        if i < len(params) - 1:
            h = jnp.maximum(h, 0.0) if activation == "relu" else jnp.tanh(h)
    return h


if __name__ == "__main__":
    # SeparableCritic(x1_dim=8, x2_dim=8, hidden_dim=32, embed_dim=16,
    #                 layers=2, activation='relu')
    x1_dim, x2_dim, hidden_dim, embed_dim, layers = 8, 8, 32, 16, 2
    batch = 8

    key = jax.random.PRNGKey(0)
    k_x, k_y, k_g, k_h, k_x2, k_y2 = jax.random.split(key, 6)
    x = jax.random.normal(k_x, (batch, x1_dim), jnp.float32)
    y = jax.random.normal(k_y, (batch, x2_dim), jnp.float32)
    g_params = init_mlp_params(k_g, x1_dim, hidden_dim, embed_dim, layers)
    h_params = init_mlp_params(k_h, x2_dim, hidden_dim, embed_dim, layers)

    ref = jnp.dot(_ref_mlp(y, h_params), _ref_mlp(x, g_params).T,
                  precision=lax.Precision.HIGHEST)

    # 1) fused small-batch path, f32 operands + f32 scores: tight check.
    s1 = jax.block_until_ready(separable_critic_forward(
        x, y, g_params, h_params, compute_dtype=jnp.float32))
    assert s1.shape == (batch, batch)
    assert jnp.allclose(s1, ref, atol=1e-4, rtol=1e-4)

    # 2) force the tiled (towers + score) path on the same inputs, f32: tight check.
    s2 = jax.block_until_ready(separable_critic_forward(
        x, y, g_params, h_params, compute_dtype=jnp.float32, fuse_max=0))
    assert s2.shape == (batch, batch)
    assert jnp.allclose(s2, ref, atol=1e-4, rtol=1e-4)

    # 3) tiled path with multi-tile grids + ragged padding/slice fallback
    #    (small tiles chosen deliberately so several grid steps run).
    nx3, ny3 = 192, 144
    x3 = jax.random.normal(k_x2, (nx3, x1_dim), jnp.float32)
    y3 = jax.random.normal(k_y2, (ny3, x2_dim), jnp.float32)
    ref3 = jnp.dot(_ref_mlp(y3, h_params), _ref_mlp(x3, g_params).T,
                   precision=lax.Precision.HIGHEST)
    s3 = jax.block_until_ready(separable_critic_forward(
        x3, y3, g_params, h_params, compute_dtype=jnp.float32, fuse_max=0,
        tower_tile_rows=128, tile_y=64, tile_x=128))
    assert s3.shape == (ny3, nx3)
    assert jnp.allclose(s3, ref3, atol=1e-3, rtol=1e-3)

    # 4) bf16 operands + bf16 scores on the tiled path (accuracy/speed knob): loose check.
    s4 = jax.block_until_ready(separable_critic_forward(
        x3, y3, g_params, h_params, compute_dtype=jnp.bfloat16,
        score_dtype=jnp.bfloat16, fuse_max=0,
        tower_tile_rows=128, tile_y=64, tile_x=128))
    assert s4.shape == (ny3, nx3)
    assert bool(jnp.all(jnp.isfinite(s4.astype(jnp.float32))))
    assert jnp.allclose(s4.astype(jnp.float32), ref3, atol=0.5, rtol=0.1)

    print("KERNEL_OK")
</pallas_src>

<mosaic_0001>
module attributes {stable_mosaic.version = 11 : i64} {
  func.func @_fused_kernel(%arg0: memref<8x8xf32, #tpu.memory_space<vmem>>, %arg1: memref<8x8xf32, #tpu.memory_space<vmem>>, %arg2: memref<8x32xf32, #tpu.memory_space<vmem>>, %arg3: memref<1x32xf32, #tpu.memory_space<vmem>>, %arg4: memref<32x32xf32, #tpu.memory_space<vmem>>, %arg5: memref<1x32xf32, #tpu.memory_space<vmem>>, %arg6: memref<32x32xf32, #tpu.memory_space<vmem>>, %arg7: memref<1x32xf32, #tpu.memory_space<vmem>>, %arg8: memref<32x16xf32, #tpu.memory_space<vmem>>, %arg9: memref<1x16xf32, #tpu.memory_space<vmem>>, %arg10: memref<8x32xf32, #tpu.memory_space<vmem>>, %arg11: memref<1x32xf32, #tpu.memory_space<vmem>>, %arg12: memref<32x32xf32, #tpu.memory_space<vmem>>, %arg13: memref<1x32xf32, #tpu.memory_space<vmem>>, %arg14: memref<32x32xf32, #tpu.memory_space<vmem>>, %arg15: memref<1x32xf32, #tpu.memory_space<vmem>>, %arg16: memref<32x16xf32, #tpu.memory_space<vmem>>, %arg17: memref<1x16xf32, #tpu.memory_space<vmem>>, %arg18: memref<8x8xf32, #tpu.memory_space<vmem>>) attributes {dimension_semantics = [], scalar_prefetch = 0 : i64, scratch_operands = 0 : i64, tpu.core_type = #tpu.core_type<tc>} {
    %c0 = arith.constant 0 : index
    %c0_0 = arith.constant 0 : index
    %0 = vector.load %arg0[%c0, %c0_0] : memref<8x8xf32, #tpu.memory_space<vmem>>, vector<8x8xf32>
    %c0_1 = arith.constant 0 : index
    %c0_2 = arith.constant 0 : index
    %1 = vector.load %arg2[%c0_1, %c0_2] : memref<8x32xf32, #tpu.memory_space<vmem>>, vector<8x32xf32>
    %c0_3 = arith.constant 0 : index
    %c0_4 = arith.constant 0 : index
    %2 = vector.load %arg3[%c0_3, %c0_4] : memref<1x32xf32, #tpu.memory_space<vmem>>, vector<1x32xf32>
    %cst = arith.constant dense<0.000000e+00> : vector<8x32xf32>
    %3 = tpu.matmul %0, %1, %cst {dimension_numbers = #tpu.dot_dimension_numbers<[1], [0], [0], [1], [0, 0, 1, 1], [], []>} : vector<8x8xf32>, vector<8x32xf32>, vector<8x32xf32> -> vector<8x32xf32>
    %4 = vector.broadcast %2 : vector<1x32xf32> to vector<8x32xf32>
    %5 = arith.addf %3, %4 : vector<8x32xf32>
    %cst_5 = arith.constant 0.000000e+00 : f32
    %6 = vector.broadcast %cst_5 : f32 to vector<8x32xf32>
    %7 = arith.maximumf %5, %6 : vector<8x32xf32>
    %c0_6 = arith.constant 0 : index
    %c0_7 = arith.constant 0 : index
    %8 = vector.load %arg4[%c0_6, %c0_7] : memref<32x32xf32, #tpu.memory_space<vmem>>, vector<32x32xf32>
    %c0_8 = arith.constant 0 : index
    %c0_9 = arith.constant 0 : index
    %9 = vector.load %arg5[%c0_8, %c0_9] : memref<1x32xf32, #tpu.memory_space<vmem>>, vector<1x32xf32>
    %cst_10 = arith.constant dense<0.000000e+00> : vector<8x32xf32>
    %10 = tpu.matmul %7, %8, %cst_10 {dimension_numbers = #tpu.dot_dimension_numbers<[1], [0], [0], [1], [0, 0, 1, 1], [], []>} : vector<8x32xf32>, vector<32x32xf32>, vector<8x32xf32> -> vector<8x32xf32>
    %11 = vector.broadcast %9 : vector<1x32xf32> to vector<8x32xf32>
    %12 = arith.addf %10, %11 : vector<8x32xf32>
    %cst_11 = arith.constant 0.000000e+00 : f32
    %13 = vector.broadcast %cst_11 : f32 to vector<8x32xf32>
    %14 = arith.maximumf %12, %13 : vector<8x32xf32>
    %c0_12 = arith.constant 0 : index
    %c0_13 = arith.constant 0 : index
    %15 = vector.load %arg6[%c0_12, %c0_13] : memref<32x32xf32, #tpu.memory_space<vmem>>, vector<32x32xf32>
    %c0_14 = arith.constant 0 : index
    %c0_15 = arith.constant 0 : index
    %16 = vector.load %arg7[%c0_14, %c0_15] : memref<1x32xf32, #tpu.memory_space<vmem>>, vector<1x32xf32>
    %cst_16 = arith.constant dense<0.000000e+00> : vector<8x32xf32>
    %17 = tpu.matmul %14, %15, %cst_16 {dimension_numbers = #tpu.dot_dimension_numbers<[1], [0], [0], [1], [0, 0, 1, 1], [], []>} : vector<8x32xf32>, vector<32x32xf32>, vector<8x32xf32> -> vector<8x32xf32>
    %18 = vector.broadcast %16 : vector<1x32xf32> to vector<8x32xf32>
    %19 = arith.addf %17, %18 : vector<8x32xf32>
    %cst_17 = arith.constant 0.000000e+00 : f32
    %20 = vector.broadcast %cst_17 : f32 to vector<8x32xf32>
    %21 = arith.maximumf %19, %20 : vector<8x32xf32>
    %c0_18 = arith.constant 0 : index
    %c0_19 = arith.constant 0 : index
    %22 = vector.load %arg8[%c0_18, %c0_19] : memref<32x16xf32, #tpu.memory_space<vmem>>, vector<32x16xf32>
    %c0_20 = arith.constant 0 : index
    %c0_21 = arith.constant 0 : index
    %23 = vector.load %arg9[%c0_20, %c0_21] : memref<1x16xf32, #tpu.memory_space<vmem>>, vector<1x16xf32>
    %cst_22 = arith.constant dense<0.000000e+00> : vector<8x16xf32>
    %24 = tpu.matmul %21, %22, %cst_22 {dimension_numbers = #tpu.dot_dimension_numbers<[1], [0], [0], [1], [0, 0, 1, 1], [], []>} : vector<8x32xf32>, vector<32x16xf32>, vector<8x16xf32> -> vector<8x16xf32>
    %25 = vector.broadcast %23 : vector<1x16xf32> to vector<8x16xf32>
    %26 = arith.addf %24, %25 : vector<8x16xf32>
    %c0_23 = arith.constant 0 : index
    %c0_24 = arith.constant 0 : index
    %27 = vector.load %arg1[%c0_23, %c0_24] : memref<8x8xf32, #tpu.memory_space<vmem>>, vector<8x8xf32>
    %c0_25 = arith.constant 0 : index
    %c0_26 = arith.constant 0 : index
    %28 = vector.load %arg10[%c0_25, %c0_26] : memref<8x32xf32, #tpu.memory_space<vmem>>, vector<8x32xf32>
    %c0_27 = arith.constant 0 : index
    %c0_28 = arith.constant 0 : index
    %29 = vector.load %arg11[%c0_27, %c0_28] : memref<1x32xf32, #tpu.memory_space<vmem>>, vector<1x32xf32>
    %cst_29 = arith.constant dense<0.000000e+00> : vector<8x32xf32>
    %30 = tpu.matmul %27, %28, %cst_29 {dimension_numbers = #tpu.dot_dimension_numbers<[1], [0], [0], [1], [0, 0, 1, 1], [], []>} : vector<8x8xf32>, vector<8x32xf32>, vector<8x32xf32> -> vector<8x32xf32>
    %31 = vector.broadcast %29 : vector<1x32xf32> to vector<8x32xf32>
    %32 = arith.addf %30, %31 : vector<8x32xf32>
    %cst_30 = arith.constant 0.000000e+00 : f32
    %33 = vector.broadcast %cst_30 : f32 to vector<8x32xf32>
    %34 = arith.maximumf %32, %33 : vector<8x32xf32>
    %c0_31 = arith.constant 0 : index
    %c0_32 = arith.constant 0 : index
    %35 = vector.load %arg12[%c0_31, %c0_32] : memref<32x32xf32, #tpu.memory_space<vmem>>, vector<32x32xf32>
    %c0_33 = arith.constant 0 : index
    %c0_34 = arith.constant 0 : index
    %36 = vector.load %arg13[%c0_33, %c0_34] : memref<1x32xf32, #tpu.memory_space<vmem>>, vector<1x32xf32>
    %cst_35 = arith.constant dense<0.000000e+00> : vector<8x32xf32>
    %37 = tpu.matmul %34, %35, %cst_35 {dimension_numbers = #tpu.dot_dimension_numbers<[1], [0], [0], [1], [0, 0, 1, 1], [], []>} : vector<8x32xf32>, vector<32x32xf32>, vector<8x32xf32> -> vector<8x32xf32>
    %38 = vector.broadcast %36 : vector<1x32xf32> to vector<8x32xf32>
    %39 = arith.addf %37, %38 : vector<8x32xf32>
    %cst_36 = arith.constant 0.000000e+00 : f32
    %40 = vector.broadcast %cst_36 : f32 to vector<8x32xf32>
    %41 = arith.maximumf %39, %40 : vector<8x32xf32>
    %c0_37 = arith.constant 0 : index
    %c0_38 = arith.constant 0 : index
    %42 = vector.load %arg14[%c0_37, %c0_38] : memref<32x32xf32, #tpu.memory_space<vmem>>, vector<32x32xf32>
    %c0_39 = arith.constant 0 : index
    %c0_40 = arith.constant 0 : index
    %43 = vector.load %arg15[%c0_39, %c0_40] : memref<1x32xf32, #tpu.memory_space<vmem>>, vector<1x32xf32>
    %cst_41 = arith.constant dense<0.000000e+00> : vector<8x32xf32>
    %44 = tpu.matmul %41, %42, %cst_41 {dimension_numbers = #tpu.dot_dimension_numbers<[1], [0], [0], [1], [0, 0, 1, 1], [], []>} : vector<8x32xf32>, vector<32x32xf32>, vector<8x32xf32> -> vector<8x32xf32>
    %45 = vector.broadcast %43 : vector<1x32xf32> to vector<8x32xf32>
    %46 = arith.addf %44, %45 : vector<8x32xf32>
    %cst_42 = arith.constant 0.000000e+00 : f32
    %47 = vector.broadcast %cst_42 : f32 to vector<8x32xf32>
    %48 = arith.maximumf %46, %47 : vector<8x32xf32>
    %c0_43 = arith.constant 0 : index
    %c0_44 = arith.constant 0 : index
    %49 = vector.load %arg16[%c0_43, %c0_44] : memref<32x16xf32, #tpu.memory_space<vmem>>, vector<32x16xf32>
    %c0_45 = arith.constant 0 : index
    %c0_46 = arith.constant 0 : index
    %50 = vector.load %arg17[%c0_45, %c0_46] : memref<1x16xf32, #tpu.memory_space<vmem>>, vector<1x16xf32>
    %cst_47 = arith.constant dense<0.000000e+00> : vector<8x16xf32>
    %51 = tpu.matmul %48, %49, %cst_47 {dimension_numbers = #tpu.dot_dimension_numbers<[1], [0], [0], [1], [0, 0, 1, 1], [], []>} : vector<8x32xf32>, vector<32x16xf32>, vector<8x16xf32> -> vector<8x16xf32>
    %52 = vector.broadcast %50 : vector<1x16xf32> to vector<8x16xf32>
    %53 = arith.addf %51, %52 : vector<8x16xf32>
    %cst_48 = arith.constant dense<0.000000e+00> : vector<8x8xf32>
    %54 = tpu.matmul %53, %26, %cst_48 {dimension_numbers = #tpu.dot_dimension_numbers<[1], [1], [0], [0], [0, 0, 1, 0], [], []>} : vector<8x16xf32>, vector<8x16xf32>, vector<8x8xf32> -> vector<8x8xf32>
    %c0_49 = arith.constant 0 : index
    %c0_50 = arith.constant 0 : index
    %55 = vector.load %arg18[%c0_49, %c0_50] : memref<8x8xf32, #tpu.memory_space<vmem>>, vector<8x8xf32>
    tpu.vector_store %arg18[%c0_49, %c0_50], %54 {strides = array<i32>} : memref<8x8xf32, #tpu.memory_space<vmem>>, vector<8x8xf32>,
    return
  }
}

</mosaic_0001>

<bundles_post_ra>
// kernel: tpu_custom_call.1
= control target key start
LH: loop header
LB: loop body
LE: loop exit
PB: predicated region body
PF: predicated region fallthrough
CT: control target
= control target key end

     0   :  { %s1706_s0 = inlined_call_operand.hbm [shape: f32[8,8], index: 0, kind: input, shape index: {}]   ;;  %s1707_s1 = inlined_call_operand.hbm [shape: f32[8,8], index: 1, kind: input, shape index: {}]   ;;  %s1708_s2 = inlined_call_operand.hbm [shape: f32[8,32], index: 2, kind: input, shape index: {}]   ;;  %s1709_s3 = inlined_call_operand.vmem [shape: f32[1,32], index: 3, kind: input, shape index: {}]   ;;  %s1710_s4 = inlined_call_operand.vmem [shape: f32[32,32], index: 4, kind: input, shape index: {}]   ;;  %s1711_s5 = inlined_call_operand.hbm [shape: f32[1,32], index: 5, kind: input, shape index: {}]   ;;  %s1712_s6 = inlined_call_operand.vmem [shape: f32[32,32], index: 6, kind: input, shape index: {}]   ;;  %s1713_s7 = inlined_call_operand.hbm [shape: f32[1,32], index: 7, kind: input, shape index: {}]   ;;  %s1714_s8 = inlined_call_operand.vmem [shape: f32[32,16], index: 8, kind: input, shape index: {}]   ;;  %s1715_s9 = inlined_call_operand.hbm [shape: f32[1,16], index: 9, kind: input, shape index: {}]   ;;  %s1716_s10 = inlined_call_operand.hbm [shape: f32[8,32], index: 10, kind: input, shape index: {}]   ;;  %s1717_s11 = inlined_call_operand.hbm [shape: f32[1,32], index: 11, kind: input, shape index: {}]   ;;  %s1718_s12 = inlined_call_operand.vmem [shape: f32[32,32], index: 12, kind: input, shape index: {}]   ;;  %s1719_s13 = inlined_call_operand.hbm [shape: f32[1,32], index: 13, kind: input, shape index: {}]   ;;  %s1720_s14 = inlined_call_operand.vmem [shape: f32[32,32], index: 14, kind: input, shape index: {}]   ;;  %s1721_s15 = inlined_call_operand.vmem [shape: f32[1,32], index: 15, kind: input, shape index: {}]   ;;  %s1722_s16 = inlined_call_operand.vmem [shape: f32[32,16], index: 16, kind: input, shape index: {}]   ;;  %s1723_s17 = inlined_call_operand.vmem [shape: f32[1,16], index: 17, kind: input, shape index: {}]   ;;  %s1724_s18 = inlined_call_operand.hbm [shape: f32[8,8], index: 18, kind: output, shape index: {}]  }
   0x1   :  { %1728 = sst [smem:[#allocation24_spill]] %s1706_s0 }
   0x2   :  { %1729 = sst [smem:[#allocation25_spill]] %s1707_s1 }
   0x3   :  { %1730 = sst [smem:[#allocation26_spill]] %s1708_s2 }
   0x4   :  { %23 = vsyncpa [#allocation3], 0 }
   0x5   :  { %24 = vsyncpa [#allocation6], 0 }
   0x6   :  { %25 = vsyncpa [#allocation9], 0 }
   0x7   :  { %26 = vsyncpa [#allocation12], 0 }
   0x8   :  { %27 = vsyncpa [#allocation15], 0 }
   0x9   :  { %28 = vsyncpa [#allocation4], 0  ;;  %s1353_s27 = smov [#allocation5]   ;;  %s1354_s29 = smov [#allocation8]  }
   0xa   :  { %s45_s28 = sshll.u32 %s1353_s27, 4  ;;  %s69_s30 = sshll.u32 %s1354_s29, 4  ;;  %s46_s28 = int_to_ptr.vmem [resolvable:$true] %s45_s28  ;;  %s70_s30 = int_to_ptr.vmem [resolvable:$true] %s69_s30 }
   0xb   :  { %s1731_s1 = sld [smem:[#allocation25_spill]] }
  0x11   :  { %s1121_s20 = scalar_lea.hbm %s1731_s1, 128 }
  0x12   :  { %p1122_p0 = scmp.ne.s32.totalorder %s1731_s1, %s1121_s20  ;;  %p1125_p1 = scmp.lt.u32.totalorder %s1121_s20, %s1731_s1 }
  0x14   :  { %p1127_p2 = pnand %p1125_p1, %p1122_p0 }
  0x16   :  { %1130 = shalt.err (!%p1127_p2)
}
  0x17   :  { %s1131_s24 = scalar_lea.vmem %s46_s28, 128  ;;  %p1136_p4 = scmp.lt.s32.totalorder %s46_s28, %s46_s28 }
  0x18   :  { %p1132_p3 = scmp.ne.s32.totalorder %s46_s28, %s1131_s24  ;;  %p1137_p5 = scmp.lt.s32.totalorder %s1131_s24, %s1131_s24 }
  0x1a   :  { %p1138_p6 = por %p1137_p5, %p1136_p4 }
  0x1c   :  { %p1139_p7 = pnand %p1138_p6, %p1132_p3 }
  0x1e   :  { %1142 = shalt.err (!%p1139_p7)
}
  0x1f   :  { %48 = dma.hbm_to_vmem [thread:$0]  %s1731_s1, 128, %s46_s28, [#allocation6]  }
  0x20   :  { %s1143_s0 = scalar_lea.hbm %s1711_s5, 16 }
  0x21   :  { %p1144_p8 = scmp.ne.s32.totalorder %s1711_s5, %s1143_s0  ;;  %p1147_p9 = scmp.lt.u32.totalorder %s1143_s0, %s1711_s5 }
  0x23   :  { %p1149_p10 = pnand %p1147_p9, %p1144_p8 }
  0x25   :  { %1152 = shalt.err (!%p1149_p10)
}
  0x26   :  { %s1153_s2 = scalar_lea.vmem %s70_s30, 16  ;;  %s1157_s23 = scalar_lea.vmem %s70_s30, 32 }
  0x27   :  { %p1154_p11 = scmp.ne.s32.totalorder %s70_s30, %s1153_s2  ;;  %p1158_p12 = scmp.lt.s32.totalorder %s70_s30, %s70_s30 }
  0x28   :  { %p1159_p13 = scmp.lt.s32.totalorder %s1157_s23, %s1153_s2 }
  0x2a   :  { %p1160_p0 = por %p1159_p13, %p1158_p12 }
  0x2c   :  { %p1161_p1 = pnand %p1160_p0, %p1154_p11 }
  0x2e   :  { %1164 = shalt.err (!%p1161_p1)
}
  0x2f   :  { %72 = dma.hbm_to_vmem [thread:$0]  %s1711_s5, 16, %s70_s30, [#allocation9]  }
  0x30   :  { %s1355_s24 = smov [#allocation11]   ;;  %s1356_s26 = smov [#allocation14]  }
  0x31   :  { %s93_s25 = sshll.u32 %s1355_s24, 4  ;;  %s113_s27 = sshll.u32 %s1356_s26, 4  ;;  %s94_s25 = int_to_ptr.vmem [resolvable:$true] %s93_s25  ;;  %s114_s27 = int_to_ptr.vmem [resolvable:$true] %s113_s27 }
  0x32   :  { %s1165_s19 = scalar_lea.hbm %s1715_s9, 16 }
  0x33   :  { %p1166_p2 = scmp.ne.s32.totalorder %s1715_s9, %s1165_s19  ;;  %p1169_p3 = scmp.lt.u32.totalorder %s1165_s19, %s1715_s9 }
  0x35   :  { %p1171_p4 = pnand %p1169_p3, %p1166_p2 }
  0x37   :  { %1174 = shalt.err (!%p1171_p4)
}
  0x38   :  { %s1175_s5 = scalar_lea.vmem %s94_s25, 16  ;;  %s1179_s30 = scalar_lea.vmem %s94_s25, 32 }
  0x39   :  { %p1176_p5 = scmp.ne.s32.totalorder %s94_s25, %s1175_s5  ;;  %p1180_p6 = scmp.lt.s32.totalorder %s94_s25, %s94_s25 }
  0x3a   :  { %p1181_p7 = scmp.lt.s32.totalorder %s1179_s30, %s1175_s5 }
  0x3c   :  { %p1182_p8 = por %p1181_p7, %p1180_p6 }
  0x3e   :  { %p1183_p9 = pnand %p1182_p8, %p1176_p5 }
  0x40   :  { %1186 = shalt.err (!%p1183_p9)
}
  0x41   :  { %96 = dma.hbm_to_vmem [thread:$0]  %s1715_s9, 16, %s94_s25, [#allocation12]  }
  0x42   :  { %s1187_s26 = scalar_lea.hbm %s1717_s11, 16 }
  0x43   :  { %p1188_p10 = scmp.ne.s32.totalorder %s1717_s11, %s1187_s26  ;;  %p1191_p11 = scmp.lt.u32.totalorder %s1187_s26, %s1717_s11 }
  0x45   :  { %p1193_p12 = pnand %p1191_p11, %p1188_p10 }
  0x47   :  { %1196 = shalt.err (!%p1193_p12)
}
  0x48   :  { %s1197_s20 = scalar_lea.vmem %s114_s27, 16  ;;  %s1201_s22 = scalar_lea.vmem %s114_s27, 32 }
  0x49   :  { %p1198_p13 = scmp.ne.s32.totalorder %s114_s27, %s1197_s20  ;;  %p1202_p0 = scmp.lt.s32.totalorder %s114_s27, %s114_s27 }
  0x4a   :  { %p1203_p1 = scmp.lt.s32.totalorder %s1201_s22, %s1197_s20 }
  0x4c   :  { %p1204_p2 = por %p1203_p1, %p1202_p0 }
  0x4e   :  { %p1205_p3 = pnand %p1204_p2, %p1198_p13 }
  0x50   :  { %1208 = shalt.err (!%p1205_p3)
}
  0x51   :  { %116 = dma.hbm_to_vmem [thread:$0]  %s1717_s11, 16, %s114_s27, [#allocation15]  }
  0x52   :  { %s1357_s2 = smov [#allocation2]   ;;  %s1358_s30 = smov [#allocation7]  }
  0x53   :  { %s35_s5 = sshll.u32 %s1357_s2, 4  ;;  %s55_s23 = sshll.u32 %s1358_s30, 4  ;;  %s36_s5 = int_to_ptr.vmem [resolvable:$true] %s35_s5  ;;  %s56_s23 = int_to_ptr.vmem [resolvable:$true] %s55_s23 }
  0x54   :  { %s1732_s24 = sld [smem:[#allocation24_spill]] }
  0x5a   :  { %s1209_s26 = scalar_lea.hbm %s1732_s24, 128 }
  0x5b   :  { %p1210_p4 = scmp.ne.s32.totalorder %s1732_s24, %s1209_s26  ;;  %p1213_p5 = scmp.lt.u32.totalorder %s1209_s26, %s1732_s24 }
  0x5d   :  { %p1215_p6 = pnand %p1213_p5, %p1210_p4 }
  0x5f   :  { %1218 = shalt.err (!%p1215_p6)
}
  0x60   :  { %s1219_s11 = scalar_lea.vmem %s36_s5, 128  ;;  %p1224_p8 = scmp.lt.s32.totalorder %s36_s5, %s36_s5 }
  0x61   :  { %p1220_p7 = scmp.ne.s32.totalorder %s36_s5, %s1219_s11  ;;  %p1225_p9 = scmp.lt.s32.totalorder %s1219_s11, %s1219_s11 }
  0x63   :  { %p1226_p10 = por %p1225_p9, %p1224_p8 }
  0x65   :  { %p1227_p11 = pnand %p1226_p10, %p1220_p7 }
  0x67   :  { %1230 = shalt.err (!%p1227_p11)
}
  0x68   :  { %38 = dma.hbm_to_vmem [thread:$0]  %s1732_s24, 128, %s36_s5, [#allocation3]  }
  0x69   :  { %s1733_s25 = sld [smem:[#allocation26_spill]] }
  0x6f   :  { %s1231_s2 = scalar_lea.hbm %s1733_s25, 128 }
  0x70   :  { %p1232_p12 = scmp.ne.s32.totalorder %s1733_s25, %s1231_s2  ;;  %p1235_p13 = scmp.lt.u32.totalorder %s1231_s2, %s1733_s25 }
  0x72   :  { %p1237_p0 = pnand %p1235_p13, %p1232_p12 }
  0x74   :  { %1240 = shalt.err (!%p1237_p0)
}
  0x75   :  { %s1241_s29 = scalar_lea.vmem %s56_s23, 128  ;;  %p1246_p2 = scmp.lt.s32.totalorder %s56_s23, %s56_s23 }
  0x76   :  { %p1242_p1 = scmp.ne.s32.totalorder %s56_s23, %s1241_s29  ;;  %p1247_p3 = scmp.lt.s32.totalorder %s1241_s29, %s1241_s29 }
  0x78   :  { %p1248_p4 = por %p1247_p3, %p1246_p2 }
  0x7a   :  { %p1249_p5 = pnand %p1248_p4, %p1242_p1 }
  0x7c   :  { %1252 = shalt.err (!%p1249_p5)
}
  0x7d   :  { %58 = dma.hbm_to_vmem [thread:$0]  %s1733_s25, 128, %s56_s23, [#allocation6]  }
  0x7e   :  { %s1359_s0 = smov [#allocation10]   ;;  %s1360_s21 = smov [#allocation13]  }
  0x7f   :  { %s81_s19 = sshll.u32 %s1359_s0, 4  ;;  %s103_s11 = sshll.u32 %s1360_s21, 4  ;;  %s82_s19 = int_to_ptr.vmem [resolvable:$true] %s81_s19  ;;  %s104_s11 = int_to_ptr.vmem [resolvable:$true] %s103_s11 }
  0x80   :  { %s1253_s22 = scalar_lea.hbm %s1713_s7, 16 }
  0x81   :  { %p1254_p6 = scmp.ne.s32.totalorder %s1713_s7, %s1253_s22  ;;  %p1257_p7 = scmp.lt.u32.totalorder %s1253_s22, %s1713_s7 }
  0x83   :  { %p1259_p8 = pnand %p1257_p7, %p1254_p6 }
  0x85   :  { %1262 = shalt.err (!%p1259_p8)
}
  0x86   :  { %s1263_s23 = scalar_lea.vmem %s82_s19, 16  ;;  %s1267_s25 = scalar_lea.vmem %s82_s19, 32 }
  0x87   :  { %p1264_p9 = scmp.ne.s32.totalorder %s82_s19, %s1263_s23  ;;  %p1268_p10 = scmp.lt.s32.totalorder %s82_s19, %s82_s19 }
  0x88   :  { %p1269_p11 = scmp.lt.s32.totalorder %s1267_s25, %s1263_s23 }
  0x8a   :  { %p1270_p12 = por %p1269_p11, %p1268_p10 }
  0x8c   :  { %p1271_p13 = pnand %p1270_p12, %p1264_p9 }
  0x8e   :  { %1274 = shalt.err (!%p1271_p13)
}
  0x8f   :  { %84 = dma.hbm_to_vmem [thread:$0]  %s1713_s7, 16, %s82_s19, [#allocation9]  }
  0x90   :  { %s1275_s24 = scalar_lea.hbm %s1716_s10, 128 }
  0x91   :  { %p1276_p0 = scmp.ne.s32.totalorder %s1716_s10, %s1275_s24  ;;  %p1279_p1 = scmp.lt.u32.totalorder %s1275_s24, %s1716_s10 }
  0x93   :  { %p1281_p2 = pnand %p1279_p1, %p1276_p0 }
  0x95   :  { %1284 = shalt.err (!%p1281_p2)
}
  0x96   :  { %s1285_s22 = scalar_lea.vmem %s104_s11, 128  ;;  %p1290_p4 = scmp.lt.s32.totalorder %s104_s11, %s104_s11 }
  0x97   :  { %p1286_p3 = scmp.ne.s32.totalorder %s104_s11, %s1285_s22  ;;  %p1291_p5 = scmp.lt.s32.totalorder %s1285_s22, %s1285_s22 }
  0x99   :  { %p1292_p6 = por %p1291_p5, %p1290_p4 }
  0x9b   :  { %p1293_p7 = pnand %p1292_p6, %p1286_p3 }
  0x9d   :  { %1296 = shalt.err (!%p1293_p7)
}
  0x9e   :  { %106 = dma.hbm_to_vmem [thread:$0]  %s1716_s10, 128, %s104_s11, [#allocation12]  }
  0x9f   :  { %s1361_s9 = smov [#allocation16]   ;;  %s1297_s23 = scalar_lea.hbm %s1719_s13, 16 }
  0xa0   :  { %s125_s2 = sshll.u32 %s1361_s9, 4  ;;  %p1298_p8 = scmp.ne.s32.totalorder %s1719_s13, %s1297_s23  ;;  %s126_s2 = int_to_ptr.vmem [resolvable:$true] %s125_s2 }
  0xa1   :  { %p1301_p9 = scmp.lt.u32.totalorder %s1297_s23, %s1719_s13 }
  0xa3   :  { %p1303_p10 = pnand %p1301_p9, %p1298_p8 }
  0xa5   :  { %1306 = shalt.err (!%p1303_p10)
}
  0xa6   :  { %s1307_s5 = scalar_lea.vmem %s126_s2, 16  ;;  %s1311_s10 = scalar_lea.vmem %s126_s2, 32 }
  0xa7   :  { %p1308_p11 = scmp.ne.s32.totalorder %s126_s2, %s1307_s5  ;;  %p1312_p12 = scmp.lt.s32.totalorder %s126_s2, %s126_s2 }
  0xa8   :  { %p1313_p13 = scmp.lt.s32.totalorder %s1311_s10, %s1307_s5 }
  0xaa   :  { %p1314_p0 = por %p1313_p13, %p1312_p12 }
  0xac   :  { %p1315_p1 = pnand %p1314_p0, %p1308_p11 }
  0xae   :  { %1318 = shalt.err (!%p1315_p1)
}
  0xaf   :  { %128 = dma.hbm_to_vmem [thread:$0]  %s1719_s13, 16, %s126_s2, [#allocation15]  }
  0xb0   :  { %1341 = dma.done.wait [#allocation3], 128  }
  0xb1   :  { %1342 = vsyncadd [#allocation3], 4294967168 }
  0xb2   :  { %1343 = dma.done.wait [#allocation6], 256  }
  0xb3   :  { %1344 = vsyncadd [#allocation6], 4294967040 }
  0xb4   :  { %1345 = dma.done.wait [#allocation9], 32  }
  0xb5   :  { %1346 = vsyncadd [#allocation9], 4294967264 }
  0xb6   :  { %1347 = dma.done.wait [#allocation12], 144  }
  0xb7   :  { %1348 = vsyncadd [#allocation12], 4294967152 }
  0xb8   :  { %1349 = dma.done.wait [#allocation15], 32  }
  0xb9   :  { %1350 = vsyncadd [#allocation15], 4294967264  ;;  %v1362_v0 = vmov 0.0   ;;  %vm1363_vm0 = vmmov 0   ;;  %v1364_v1 = vmov 0.0|0.0   ;;  %vm173_vm1 = vcmask 64512  }
  0xba   :  { %991 = vmatprep.subr.mxu0 %v1362_v0  ;;  %993 = vmatprep.mubr.msk.f32.mxu0 %vm1363_vm0, %v1362_v0  ;;  %v165_v2 = vld [vmem:[#allocation7] sm:$0xff]  ;;  %v164_v3 = vld [vmem:[#allocation2] sm:$0xff]  ;;  %v249_v5 = vld [vmem:[%s1710_s4 + $0x8] sm:$0xff]  ;;  %vm259_vm2 = vcmask 261120   ;;  %vm840_vm3 = vcmask 130048  }
  0xbb   :  { %1072 = vmatprep.subr.bf16.mxu1 %v1364_v1  ;;  %1004 = vmatprep.mubr.msk.f32.mxu1 %vm1363_vm0, %v1362_v0  ;;  %v248_v4 = vld [vmem:[%s1710_s4] sm:$0xff]  ;;  %v250_v7 = vld [vmem:[%s1710_s4 + $0x10] sm:$0xff]  ;;  %v251_v8 = vld [vmem:[%s1710_s4 + $0x18] sm:$0xff] }
  0xbc   :  { %992 = vmatpush3.msra.mxu0 %v165_v2  ;;  %v1073_v6 = vpack.c.bf16 %v249_v5, %v248_v4  ;;  %v1076_v9 = vpack.c.bf16 %v251_v8, %v250_v7  ;;  %v334_v10 = vld [vmem:[%s1712_s6] sm:$0xff]  ;;  %v335_v11 = vld [vmem:[%s1712_s6 + $0x8] sm:$0xff]  ;;  %v336_v18 = vld [vmem:[%s1712_s6 + $0x10] sm:$0xff] }
  0xbd   :  { %994 = vmatmul.mubr.msk.f32.vlgmr.msra.gmra.mrb[0].mxu0 %vm173_vm1, %v164_v3  ;;  %1078 = vmatprep.subr.bf16.mxu0 %v1364_v1  ;;  %v1079_v12 = vpack.c.bf16 %v335_v11, %v334_v10  ;;  %v937_v13 = vld [vmem:[%s1709_s3] ss:$0 sm:$0xff]  ;;  %v337_v19 = vld [vmem:[%s1712_s6 + $0x18] sm:$0xff]  ;;  %v420_v22 = vld [vmem:[%s1714_s8 + $0x8] sm:$0xff] }
  0xbe   :  { %1015 = vmatprep.mubr.msk.f32.mxu0 %vm1363_vm0, %v1362_v0  ;;  %1074 = vmatpush3.bf16.msra.mxu1 %v1073_v6  ;;  %v1082_v20 = vpack.c.bf16 %v337_v19, %v336_v18  ;;  %v419_v21 = vld [vmem:[%s1714_s8] sm:$0xff]  ;;  %v939_v24 = vld [vmem:[#allocation8] ss:$0 sm:$0xff]  ;;  %v503_v30 = vld [vmem:[#allocation5] sm:$0xff] }
  0xbf   :  { %1075 = vmatprep.subr.bf16.mxu1 %v1364_v1  ;;  %1080 = vmatpush3.bf16.msra.mxu0 %v1079_v12  ;;  %v1085_v23 = vpack.c.bf16 %v420_v22, %v419_v21  ;;  %v504_v29 = vld [vmem:[#allocation13] sm:$0xff]  ;;  %v421_v31 = vld [vmem:[%s1714_s8 + $0x10] sm:$0xff]  ;;  %v587_v35 = vld [vmem:[%s1718_s12 + $0x8] sm:$0xff] }
  0xc0   :  { %1081 = vmatprep.subr.bf16.mxu0 %v1364_v1  ;;  %v422_v32 = vld [vmem:[%s1714_s8 + $0x18] sm:$0xff]  ;;  %v586_v33 = vld [vmem:[%s1718_s12] sm:$0xff]  ;;  %v588_v37 = vld [vmem:[%s1718_s12 + $0x10] sm:$0xff] }
  0xc1   :  { %v1088_v34 = vpack.c.bf16 %v422_v32, %v421_v31  ;;  %v1091_v36 = vpack.c.bf16 %v587_v35, %v586_v33  ;;  %v589_v38 = vld [vmem:[%s1718_s12 + $0x18] sm:$0xff]  ;;  %v671_v41 = vld [vmem:[%s1720_s14] sm:$0xff]  ;;  %v672_v42 = vld [vmem:[%s1720_s14 + $0x8] sm:$0xff] }
  0xc2   :  { %1077 = vmatpush3.bf16.msra.mxu1 %v1076_v9  ;;  %v1094_v39 = vpack.c.bf16 %v589_v38, %v588_v37  ;;  %v941_v40 = vld [vmem:[#allocation10] ss:$0 sm:$0xff]  ;;  %v945_v46 = vld [vmem:[#allocation14] ss:$0 sm:$0xff]  ;;  %v1097_v47 = vpack.c.bf16 %v672_v42, %v671_v41  ;;  %v673_v53 = vld [vmem:[%s1720_s14 + $0x10] sm:$0xff] }
  0xc3   :  { %1084 = vmatprep.subr.bf16.mxu1 %v1364_v1  ;;  %1083 = vmatpush3.bf16.msra.mxu0 %v1082_v20  ;;  %v674_v54 = vld [vmem:[%s1720_s14 + $0x18] sm:$0xff]  ;;  %v756_v56 = vld [vmem:[%s1722_s16] sm:$0xff]  ;;  %v757_v57 = vld [vmem:[%s1722_s16 + $0x8] sm:$0xff] }
  0xc4   :  { %1029 = vmatprep.subr.mxu0 %v1362_v0  ;;  %v1100_v55 = vpack.c.bf16 %v674_v54, %v673_v53  ;;  %v1103_v58 = vpack.c.bf16 %v757_v57, %v756_v56  ;;  %v947_v61 = vld [vmem:[#allocation16] ss:$0 sm:$0xff]  ;;  %v943_v63 = vld [vmem:[#allocation11] ss:$0 sm:$0xff]  ;;  %v949_v8 = vld [vmem:[%s1721_s15] ss:$0 sm:$0xff] }
  0xc5   :  { %v759_v6 = vld [vmem:[%s1722_s16 + $0x18] sm:$0xff] }
 0x190   :  { %v243_v14 = vpop.f32.mrb[0].mxu0 }
 0x191   :  { %v244_v15 = vadd.f32 %v937_v13, %v243_v14  ;;  %v995_v16 = vpop.f32.mrb[1].mxu0 }
 0x193   :  { %v247_v17 = vmax.f32 %v244_v15, 0.0 }
 0x195   :  { %1005 = vmatmul.mubr.msk.f32.vlgmr.msra.gmra.mrb[0].mxu1 %vm259_vm2, %v247_v17 }
 0x196   :  { %1026 = vmatprep.mubr.msk.f32.mxu1 %vm1363_vm0, %v1362_v0  ;;  %1086 = vmatpush3.bf16.msra.mxu1 %v1085_v23 }
 0x197   :  { %1087 = vmatprep.subr.bf16.mxu1 %v1364_v1 }
 0x19a   :  { %1089 = vmatpush3.bf16.msra.mxu1 %v1088_v34 }
 0x19b   :  { %1096 = vmatprep.subr.bf16.mxu1 %v1364_v1 }
 0x268   :  { %v329_v25 = vpop.f32.mrb[0].mxu1 }
 0x269   :  { %v330_v26 = vadd.f32 %v939_v24, %v329_v25  ;;  %v1006_v27 = vpop.f32.mrb[1].mxu1 }
 0x26b   :  { %v333_v28 = vmax.f32 %v330_v26, 0.0 }
 0x26d   :  { %1016 = vmatmul.mubr.msk.f32.vlgmr.msra.gmra.mrb[2].mxu0 %vm259_vm2, %v333_v28 }
 0x26e   :  { %1030 = vmatpush3.msra.mxu0 %v504_v29  ;;  %1031 = vmatprep.mubr.msk.f32.mxu0 %vm1363_vm0, %v1362_v0 }
 0x26f   :  { %1090 = vmatprep.subr.bf16.mxu0 %v1364_v1 }
 0x271   :  { %1032 = vmatmul.mubr.msk.f32.vlgmr.msra.gmra.mrb[4].mxu0 %vm173_vm1, %v503_v30 }
 0x272   :  { %1042 = vmatprep.mubr.msk.f32.mxu0 %vm1363_vm0, %v1362_v0  ;;  %1092 = vmatpush3.bf16.msra.mxu0 %v1091_v36 }
 0x273   :  { %1093 = vmatprep.subr.bf16.mxu0 %v1364_v1 }
 0x276   :  { %1095 = vmatpush3.bf16.msra.mxu0 %v1094_v39 }
 0x277   :  { %1102 = vmatprep.subr.bf16.mxu0 %v1364_v1 }
 0x340   :  { %v414_v43 = vpop.f32.mrb[2].mxu0 }
 0x341   :  { %v415_v44 = vadd.f32 %v941_v40, %v414_v43  ;;  %v1017_v45 = vpop.f32.mrb[3].mxu0 }
 0x343   :  { %v418_v48 = vmax.f32 %v415_v44, 0.0 }
 0x344   :  { %v581_v49 = vpop.f32.mrb[4].mxu0 }
 0x345   :  { %v582_v50 = vadd.f32 %v945_v46, %v581_v49  ;;  %1027 = vmatmul.mubr.msk.f32.vlgmr.msra.gmra.mrb[2].mxu1 %vm259_vm2, %v418_v48  ;;  %v1033_v51 = vpop.f32.mrb[5].mxu0 }
 0x346   :  { %1098 = vmatpush3.bf16.msra.mxu1 %v1097_v47  ;;  %1053 = vmatprep.mubr.msk.f32.mxu1 %vm1363_vm0, %v1362_v0 }
 0x347   :  { %v585_v52 = vmax.f32 %v582_v50, 0.0  ;;  %1099 = vmatprep.subr.bf16.mxu1 %v1364_v1 }
 0x349   :  { %1043 = vmatmul.mubr.msk.f32.vlgmr.msra.gmra.mrb[6].mxu0 %vm259_vm2, %v585_v52 }
 0x34a   :  { %1064 = vmatprep.mubr.msk.f32.mxu0 %vm1363_vm0, %v1362_v0  ;;  %1101 = vmatpush3.bf16.msra.mxu1 %v1100_v55 }
 0x34b   :  { %1067 = vmatprep.subr.mxu1 %v1362_v0  ;;  %1104 = vmatpush3.bf16.msra.mxu0 %v1103_v58 }
 0x34c   :  { %1105 = vmatprep.subr.bf16.mxu0 %v1364_v1  ;;  %v758_v1 = vld [vmem:[%s1722_s16 + $0x10] sm:$0xff]  ;;  %s1365_s16 = smov [#allocation17]  }
 0x34d   :  { %v1106_v7 = vpack.c.bf16 %v759_v6, %v758_v1  ;;  %s924_s27 = sshll.u32 %s1365_s16, 4  ;;  %s925_s27 = int_to_ptr.vmem [resolvable:$true] %s924_s27 }
 0x34e   :  { %s1319_s15 = scalar_lea.vmem %s925_s27, 128  ;;  %p1324_p3 = scmp.lt.s32.totalorder %s925_s27, %s925_s27 }
 0x34f   :  { %1107 = vmatpush3.bf16.msra.mxu0 %v1106_v7  ;;  %p1320_p2 = scmp.ne.s32.totalorder %s925_s27, %s1319_s15  ;;  %p1325_p4 = scmp.lt.s32.totalorder %s1319_s15, %s1319_s15 }
 0x351   :  { %p1326_p5 = por %p1325_p4, %p1324_p3 }
 0x353   :  { %p1327_p6 = pnand %p1326_p5, %p1320_p2 }
 0x418   :  { %v499_v59 = vpop.f32.mrb[2].mxu1 }
 0x419   :  { %v1028_v60 = vpop.f32.mrb[3].mxu1  ;;  %v500_v5 = vadd.f32 %v943_v63, %v499_v59 }
 0x41c   :  { %v666_v62 = vpop.f32.mrb[6].mxu0 }
 0x41d   :  { %v667_v2 = vadd.f32 %v947_v61, %v666_v62  ;;  %v1044_v3 = vpop.f32.mrb[7].mxu0 }
 0x41f   :  { %v670_v4 = vmax.f32 %v667_v2, 0.0 }
 0x421   :  { %1054 = vmatmul.mubr.msk.f32.vlgmr.msra.gmra.mrb[4].mxu1 %vm259_vm2, %v670_v4 }
 0x422   :  { %1068 = vmatpush3.xpose.msk.msra.mxu1 %vm840_vm3, %v500_v5  ;;  %1069 = vmatprep.mubr.msk.f32.mxu1 %vm1363_vm0, %v1362_v0  ;;  %v951_v0 = vld [vmem:[%s1723_s17] ss:$0 sm:$0xff] }
 0x4f4   :  { %v751_v9 = vpop.f32.mrb[4].mxu1 }
 0x4f5   :  { %v752_v10 = vadd.f32 %v949_v8, %v751_v9  ;;  %v1055_v11 = vpop.f32.mrb[5].mxu1 }
 0x4f7   :  { %v755_v12 = vmax.f32 %v752_v10, 0.0 }
 0x4f9   :  { %1065 = vmatmul.mubr.msk.f32.vlgmr.msra.gmra.mrb[8].mxu0 %vm259_vm2, %v755_v12 }
 0x5cc   :  { %v836_v13 = vpop.f32.mrb[8].mxu0 }
 0x5cd   :  { %v837_v14 = vadd.f32 %v951_v0, %v836_v13  ;;  %v1066_v15 = vpop.f32.mrb[9].mxu0 }
 0x5cf   :  { %1070 = vmatmul.mubr.msk.f32.vlgmr.msra.gmra.mrb[6].mxu1 %vm840_vm3, %v837_v14 }
 0x6a2   :  { %v913_v16 = vpop.f32.mrb[6].mxu1 }
 0x6a3   :  { %917 = vst.msk [vmem:[#allocation17] sm:$0xff] %vm173_vm1, %v913_v16  ;;  %v1071_v17 = vpop.f32.mrb[7].mxu1 }
 0x6a4   :  { %1330 = shalt.err (!%p1327_p6)
}
 0x6a5   :  { %s1331_s22 = scalar_lea.hbm %s1724_s18, 128 }
 0x6a6   :  { %p1332_p7 = scmp.ne.s32.totalorder %s1724_s18, %s1331_s22  ;;  %p1335_p8 = scmp.lt.u32.totalorder %s1331_s22, %s1724_s18 }
 0x6a8   :  { %p1337_p9 = pnand %p1335_p8, %p1332_p7 }
 0x6aa   :  { %1340 = shalt.err (!%p1337_p9)
}
 0x6ab   :  { %927 = dma.vmem_to_hbm [thread:$0]  %s925_s27, 128, %s1724_s18, [#allocation4]  }
 0x6ac   :  { %1351 = dma.done.wait [#allocation4], 128  }
 0x6ad   :  { %1352 = vsyncadd [#allocation4], 4294967168 }
 0x6ae   :  { %931 = vsyncpa [#allocation3], 1 }
 0x6af   :  { %932 = vsyncpa [#allocation6], 1 }
 0x6b0   :  { %933 = vsyncpa [#allocation9], 1 }
 0x6b1   :  { %934 = vsyncpa [#allocation12], 1 }
 0x6b2   :  { %935 = vsyncpa [#allocation15], 1 }
 0x6b3   :  { %936 = vsyncpa [#allocation4], 1 }

</bundles_post_ra>
